<compile_context>
chip_gen: v7x
topology: tpu7x:2x2x1
jax: 0.10.0
libtpu: 0.0.40
codegen_flags: <defaults>
</compile_context>

<pallas_src>
import jax
import jax.numpy as jnp
from jax.experimental import pallas as pl
from jax.experimental.pallas import tpu as pltpu


# ---------------------------------------------------------------------------
# Kernels
# ---------------------------------------------------------------------------

def _layer1_kernel(x_ref, w1_ref, b1_ref, h_ref):
    """h = tanh(x @ w1 + b1).  Single whole-array block (tiny vs layer 2)."""
    x = x_ref[...].astype(w1_ref.dtype)                  # bf16 MXU inputs
    h = jnp.dot(x, w1_ref[...], preferred_element_type=jnp.float32)
    h_ref[...] = jnp.tanh(h + b1_ref[...]).astype(h_ref.dtype)   # f32 tanh/EUP


def _layer2_kernel(h_ref, w2_ref, scale_ref, b2_ref, o_ref):
    """One (B, tn) output tile: y = (h @ dequant(w2_tile)) * scale + b2."""
    w2 = w2_ref[...].astype(jnp.float32)                 # int8 -> f32 dequant (VPU)
    y = jnp.dot(h_ref[...], w2, preferred_element_type=jnp.float32)
    o_ref[...] = (y * scale_ref[...] + b2_ref[...]).astype(o_ref.dtype)


# ---------------------------------------------------------------------------
# Device-aware tiling helpers
# ---------------------------------------------------------------------------

def _device_vmem_bytes():
    """Physical VMEM of the current chip (128 MiB v5e/v6e, 64 MiB v7x)."""
    try:
        info = pltpu.get_tpu_info()
        v = getattr(info, "vmem_capacity_bytes", None)
        if v:
            return int(v)
    except Exception:
        pass
    return 64 << 20        # conservative fallback (v7x per-TensorCore VMEM)


def _pick_tn(out_dim, per_col_bytes, vmem_budget_bytes, min_tiles=4):
    """Largest output-tile width that (a) divides out_dim, (b) is 256-aligned
    (128 fallback; whole-array for tiny shapes), (c) fits the VMEM budget and
    (d) leaves >= min_tiles grid steps for pipelining / megacore sharding."""
    max_tn = max(vmem_budget_bytes // max(per_col_bytes, 1), 128)
    if out_dim >= min_tiles * 256:
        max_tn = min(max_tn, out_dim // min_tiles)
    if out_dim <= 256 and out_dim <= max_tn:
        return out_dim                                   # tiny shapes: one block
    for align in (256, 128):                             # 256 for v6e/v7x MXU
        tn = min((max_tn // align) * align, out_dim)
        while tn >= align:
            if out_dim % tn == 0:
                return tn
            tn -= align
    # TODO(synk): out_dim without any 128-multiple divisor would need padding.
    return out_dim


def quantize_w_int8(w):
    """Per-output-column symmetric int8 quantisation: w ~= w_q * scale."""
    amax = jnp.max(jnp.abs(w), axis=0, keepdims=True)
    scale = (jnp.maximum(amax, 1e-12) / 127.0).astype(jnp.float32)
    w_q = jnp.clip(jnp.round(w / scale), -127.0, 127.0).astype(jnp.int8)
    return w_q, scale


# ---------------------------------------------------------------------------
# Wrapper
# ---------------------------------------------------------------------------

def mlp_mapping_network(clip_embed, w1, b1, w2_q, w2_scale, b2, prefix_len,
                        *, tn=None, out_dtype=jnp.float32):
    """clipcap mapping MLP: Linear -> Tanh -> Linear -> view(B, prefix_len, -1).

    Layer 1 is a tiny single-block pallas_call producing h (kept resident);
    layer 2 streams the int8 w2 through VMEM in (hidden, tn) slabs and is the
    HBM-bandwidth-bound part.  The tile axis is "parallel" (megacore-friendly).
    """
    B, clip_dim = clip_embed.shape
    hidden = w1.shape[1]
    out_dim = w2_q.shape[1]
    assert w1.shape[0] == clip_dim and w2_q.shape[0] == hidden

    # Pad batch to the 8-sublane boundary: removes masked partial-vreg work for
    # ~zero extra HBM traffic.  Padded rows are dropped after the kernels.
    b_pad = max(8, -(-B // 8) * 8)
    x = clip_embed
    if b_pad != B:
        x = jnp.zeros((b_pad, clip_dim), clip_embed.dtype).at[:B, :].set(clip_embed)

    # ---- layer 1: h = tanh(x @ w1 + b1) (whole-array single block, f32 h) ----
    h = pl.pallas_call(
        _layer1_kernel,
        out_shape=jax.ShapeDtypeStruct((b_pad, hidden), jnp.float32),
    )(x, w1, b1)

    # ---- layer 2 tiling: device-aware VMEM budget -> tn ----
    vmem_phys = _device_vmem_bytes()
    headroom = (12 << 20) if vmem_phys <= (64 << 20) else (16 << 20)
    vmem_budget = vmem_phys - headroom

    out_itemsize = jnp.dtype(out_dtype).itemsize
    w2_itemsize = jnp.dtype(w2_q.dtype).itemsize
    resident = 2 * b_pad * hidden * 4                              # h (const index_map)
    per_col = (2 * (hidden * w2_itemsize + b_pad * out_itemsize + 4 + 4)  # streamed, 2-buffered
               + hidden * 4)                                       # f32 dequant temp (1 tile)

    if tn is None:
        tn = _pick_tn(out_dim, per_col, vmem_budget - resident)
    assert out_dim % tn == 0, (out_dim, tn)
    num_tiles = out_dim // tn

    footprint = resident + per_col * tn
    # tn was derived from the device budget, so this never clamps the limit
    # below the kernel's actual requirement (review: shrink tn, not the limit).
    vmem_limit = int(min(max(footprint + (4 << 20), 32 << 20),
                         vmem_phys - (4 << 20)))

    y = pl.pallas_call(
        _layer2_kernel,
        out_shape=jax.ShapeDtypeStruct((b_pad, out_dim), out_dtype),
        grid_spec=pltpu.PrefetchScalarGridSpec(
            num_scalar_prefetch=0,
            grid=(num_tiles,),
            in_specs=[
                pl.BlockSpec((b_pad, hidden), lambda j: (0, 0)),   # h   (resident)
                pl.BlockSpec((hidden, tn), lambda j: (0, j)),      # w2  int8 tile (streamed)
                pl.BlockSpec((1, tn), lambda j: (0, j)),           # per-column scale
                pl.BlockSpec((1, tn), lambda j: (0, j)),           # b2
            ],
            out_specs=pl.BlockSpec((b_pad, tn), lambda j: (0, j)),
        ),
        compiler_params=pltpu.CompilerParams(
            # No cross-step state -> w2 stream splits across both TCs on v7x.
            dimension_semantics=("parallel",),
            vmem_limit_bytes=vmem_limit,
        ),
    )(h, w2_q, w2_scale, b2)

    if b_pad != B:
        y = y[:B]
    return y.reshape(B, prefix_len, -1)        # x.view(x.shape[0], prefix_len, -1)


class MLPPallas:
    """Mirrors MLP(sizes=(clip_dim, hidden, out_dim), prefix_len).forward().

    w1 is stored bfloat16; w2 (the big streamed weight) is stored int8 with
    per-output-column f32 scales (dequantised on-chip).  Biases, tanh and all
    accumulation stay float32.
    """

    def __init__(self, clip_dim, prefix_len, gpt_dim, key):
        self.clip_dim, self.prefix_len, self.gpt_dim = clip_dim, prefix_len, gpt_dim
        hidden = gpt_dim * prefix_len // 2
        out_dim = gpt_dim * prefix_len

        k1, k2, k3, k4 = jax.random.split(key, 4)
        lim1 = clip_dim ** -0.5
        lim2 = hidden ** -0.5
        # Stored pre-transposed [in, out] so the kernels compute x @ W + b.
        self.w1 = jax.random.uniform(k1, (clip_dim, hidden), jnp.float32,
                                     -lim1, lim1).astype(jnp.bfloat16)
        self.b1 = jax.random.uniform(k2, (1, hidden), jnp.float32, -lim1, lim1)
        w2_f32 = jax.random.uniform(k3, (hidden, out_dim), jnp.float32, -lim2, lim2)
        self.w2_q, self.w2_scale = quantize_w_int8(w2_f32)
        self.b2 = jax.random.uniform(k4, (1, out_dim), jnp.float32, -lim2, lim2)

    def forward(self, clip_embed, *, tn=None, out_dtype=jnp.float32):
        return mlp_mapping_network(clip_embed, self.w1, self.b1, self.w2_q,
                                   self.w2_scale, self.b2, self.prefix_len,
                                   tn=tn, out_dtype=out_dtype)


def _reference_mlp(x, w1, b1, w2_q, w2_scale, b2, prefix_len):
    """Pure-JAX mirror of the kernels' precision choices (bf16 layer-1 inputs,
    int8-dequant w2, f32 accumulation everywhere)."""
    h = jnp.tanh(jnp.dot(x.astype(w1.dtype), w1,
                         preferred_element_type=jnp.float32) + b1)
    y = jnp.dot(h, w2_q.astype(jnp.float32),
                preferred_element_type=jnp.float32) * w2_scale + b2
    return y.reshape(x.shape[0], prefix_len, -1)


if __name__ == "__main__":
    key = jax.random.PRNGKey(0)

    # Case 1: toy clipcap shapes (single output tile, padded-batch path).
    B, clip_dim, prefix_len, gpt_dim = 2, 32, 8, 16     # hidden=64, out_dim=128
    k_in, k_p, key = jax.random.split(key, 3)
    clip_embed = jax.random.normal(k_in, (B, clip_dim), dtype=jnp.float32)
    model = MLPPallas(clip_dim, prefix_len, gpt_dim, k_p)

    out = jax.block_until_ready(model.forward(clip_embed))
    ref = _reference_mlp(clip_embed, model.w1, model.b1, model.w2_q,
                         model.w2_scale, model.b2, prefix_len)
    assert out.shape == (B, prefix_len, gpt_dim), out.shape
    assert jnp.allclose(out, ref, atol=2e-2, rtol=2e-2), float(
        jnp.max(jnp.abs(out - ref)))

    # Case 2: force a multi-tile grid (out_dim=512, tn=128) to exercise the
    # streamed-int8-w2 / parallel-tile-axis path.
    B2, clip2, pre2, gpt2 = 2, 64, 8, 64                # hidden=256, out_dim=512
    k_in2, k_p2 = jax.random.split(key)
    x2 = jax.random.normal(k_in2, (B2, clip2), dtype=jnp.float32)
    m2 = MLPPallas(clip2, pre2, gpt2, k_p2)
    out2 = jax.block_until_ready(m2.forward(x2, tn=128))
    ref2 = _reference_mlp(x2, m2.w1, m2.b1, m2.w2_q, m2.w2_scale, m2.b2, pre2)
    assert out2.shape == (B2, pre2, gpt2), out2.shape
    assert jnp.allclose(out2, ref2, atol=2e-2, rtol=2e-2), float(
        jnp.max(jnp.abs(out2 - ref2)))

    print("KERNEL_OK")
</pallas_src>

<mosaic_0001>
module attributes {stable_mosaic.version = 11 : i64} {
  func.func @_layer1_kernel(%arg0: memref<8x32xf32, #tpu.memory_space<vmem>>, %arg1: memref<32x64xbf16, #tpu.memory_space<vmem>>, %arg2: memref<1x64xf32, #tpu.memory_space<vmem>>, %arg3: memref<8x64xf32, #tpu.memory_space<vmem>>) attributes {dimension_semantics = [], scalar_prefetch = 0 : i64, scratch_operands = 0 : i64, tpu.core_type = #tpu.core_type<tc>} {
    %c0 = arith.constant 0 : index
    %c0_0 = arith.constant 0 : index
    %0 = vector.load %arg0[%c0, %c0_0] : memref<8x32xf32, #tpu.memory_space<vmem>>, vector<8x32xf32>
    %1 = arith.truncf %0 : vector<8x32xf32> to vector<8x32xbf16>
    %c0_1 = arith.constant 0 : index
    %c0_2 = arith.constant 0 : index
    %2 = vector.load %arg1[%c0_1, %c0_2] : memref<32x64xbf16, #tpu.memory_space<vmem>>, vector<32x64xbf16>
    %cst = arith.constant dense<0.000000e+00> : vector<8x64xf32>
    %3 = tpu.matmul %1, %2, %cst {dimension_numbers = #tpu.dot_dimension_numbers<[1], [0], [0], [1], [0, 0, 1, 1], [], []>} : vector<8x32xbf16>, vector<32x64xbf16>, vector<8x64xf32> -> vector<8x64xf32>
    %c0_3 = arith.constant 0 : index
    %c0_4 = arith.constant 0 : index
    %4 = vector.load %arg2[%c0_3, %c0_4] : memref<1x64xf32, #tpu.memory_space<vmem>>, vector<1x64xf32>
    %5 = vector.broadcast %4 : vector<1x64xf32> to vector<8x64xf32>
    %6 = arith.addf %3, %5 : vector<8x64xf32>
    %7 = math.tanh %6 : vector<8x64xf32>
    %c0_5 = arith.constant 0 : index
    %c0_6 = arith.constant 0 : index
    %8 = vector.load %arg3[%c0_5, %c0_6] : memref<8x64xf32, #tpu.memory_space<vmem>>, vector<8x64xf32>
    tpu.vector_store %arg3[%c0_5, %c0_6], %7 {strides = array<i32>} : memref<8x64xf32, #tpu.memory_space<vmem>>, vector<8x64xf32>,
    return
  }
}

</mosaic_0001>

<bundles_post_ra>
// kernel: tpu_custom_call.1
= control target key start
LH: loop header
LB: loop body
LE: loop exit
PB: predicated region body
PF: predicated region fallthrough
CT: control target
= control target key end

     0   :  { %8 = vsyncpa [#allocation3], 0  ;;  %s301_s0 = inlined_call_operand.hbm [shape: f32[8,32], index: 0, kind: input, shape index: {}]   ;;  %s302_s1 = inlined_call_operand.hbm [shape: bf16[32,64], index: 1, kind: input, shape index: {}]   ;;  %s303_s2 = inlined_call_operand.vmem [shape: f32[1,64], index: 2, kind: input, shape index: {}]   ;;  %s304_s3 = inlined_call_operand.hbm [shape: f32[8,64], index: 3, kind: output, shape index: {}]  }
   0x1   :  { %9 = vsyncpa [#allocation6], 0 }
   0x2   :  { %10 = vsyncpa [#allocation4], 0  ;;  %s228_s12 = smov [#allocation2]   ;;  %s229_s14 = smov [#allocation5]  }
   0x3   :  { %s17_s13 = sshll.u32 %s228_s12, 4  ;;  %s26_s15 = sshll.u32 %s229_s14, 4  ;;  %s18_s13 = int_to_ptr.vmem [resolvable:$true] %s17_s13  ;;  %s255_s15 = int_to_ptr.vmem [resolvable:$true] %s26_s15 }
   0x4   :  { %s156_s18 = scalar_lea.hbm %s301_s0, 128 }
   0x5   :  { %p157_p0 = scmp.ne.s32.totalorder %s301_s0, %s156_s18  ;;  %p160_p1 = scmp.lt.u32.totalorder %s156_s18, %s301_s0 }
   0x7   :  { %p162_p2 = pnand %p160_p1, %p157_p0 }
   0x9   :  { %165 = shalt.err (!%p162_p2)
}
   0xa   :  { %s166_s23 = scalar_lea.vmem %s18_s13, 128  ;;  %p171_p4 = scmp.lt.s32.totalorder %s18_s13, %s18_s13 }
   0xb   :  { %p167_p3 = scmp.ne.s32.totalorder %s18_s13, %s166_s23  ;;  %p172_p5 = scmp.lt.s32.totalorder %s166_s23, %s166_s23 }
   0xd   :  { %p173_p6 = por %p172_p5, %p171_p4 }
   0xf   :  { %p174_p7 = pnand %p173_p6, %p167_p3 }
  0x11   :  { %177 = shalt.err (!%p174_p7)
}
  0x12   :  { %20 = dma.hbm_to_vmem [thread:$0]  %s301_s0, 128, %s18_s13, [#allocation3]  }
  0x13   :  { %s178_s28 = scalar_lea.hbm %s302_s1, 256 }
  0x14   :  { %p179_p8 = scmp.ne.s32.totalorder %s302_s1, %s178_s28  ;;  %p182_p9 = scmp.lt.u32.totalorder %s178_s28, %s302_s1 }
  0x16   :  { %p184_p10 = pnand %p182_p9, %p179_p8 }
  0x18   :  { %187 = shalt.err (!%p184_p10)
}
  0x19   :  { %s188_s6 = scalar_lea.vmem %s255_s15, 256  ;;  %p193_p12 = scmp.lt.s32.totalorder %s255_s15, %s255_s15 }
  0x1a   :  { %p189_p11 = scmp.ne.s32.totalorder %s255_s15, %s188_s6  ;;  %p194_p13 = scmp.lt.s32.totalorder %s188_s6, %s188_s6 }
  0x1c   :  { %p195_p0 = por %p194_p13, %p193_p12 }
  0x1e   :  { %p196_p1 = pnand %p195_p0, %p189_p11 }
  0x20   :  { %199 = shalt.err (!%p196_p1)
}
  0x21   :  { %s230_s0 = smov 64   ;;  %s231_s7 = smov 4  }
  0x22   :  { %32 = dma.hbm_to_vmem [thread:$0]  %s302_s1, 256, %s255_s15, [#allocation6], %s230_s0, %s230_s0, %s231_s7  }
  0x23   :  { %222 = dma.done.wait [#allocation3], 128  }
  0x24   :  { %223 = vsyncadd [#allocation3], 4294967168 }
  0x25   :  { %224 = dma.done.wait [#allocation6], 256  }
  0x26   :  { %225 = vsyncadd [#allocation6], 4294967040  ;;  %v232_v0 = vmov 0.0   ;;  %vm233_vm0 = vmmov 0   ;;  %v152_v1 = vld [vmem:[#allocation5] sm:$0xff]   ;;  %v153_v2 = vld [vmem:[#allocation5 + $0x8] sm:$0xff]  }
  0x27   :  { %137 = vmatprep.subr.bf16.mxu0 %v232_v0  ;;  %141 = vmatprep.mubr.msk.bf16.mxu0 %vm233_vm0, %v232_v0  ;;  %v42_v3 = vld [vmem:[#allocation2] sm:$0xff]  ;;  %vm67_vm1 = vcmask 261120   ;;  %s234_s1 = smov [#allocation7]   ;;  %vm112_vm2 = vcmask 523264  }
  0x28   :  { %138 = vmatpush3.bf16.msra.mxu0 %v152_v1  ;;  %v43_v4 = vpack.c.bf16 %v42_v3, %v42_v3  ;;  %v130_v5 = vld [vmem:[%s303_s2] ss:$0 sm:$0xff]  ;;  %s120_s12 = sshll.u32 %s234_s1, 4  ;;  %s121_s12 = int_to_ptr.vmem [resolvable:$true] %s120_s12 }
  0x29   :  { %139 = vmatprep.subr.bf16.mxu0 %v232_v0  ;;  %s200_s13 = scalar_lea.vmem %s121_s12, 128  ;;  %p205_p3 = scmp.lt.s32.totalorder %s121_s12, %s121_s12 }
  0x2a   :  { %p201_p2 = scmp.ne.s32.totalorder %s121_s12, %s200_s13  ;;  %p206_p4 = scmp.lt.s32.totalorder %s200_s13, %s200_s13 }
  0x2c   :  { %140 = vmatpush3.bf16.msra.mxu0 %v153_v2  ;;  %p207_p5 = por %p206_p4, %p205_p3 }
  0x2e   :  { %p208_p6 = pnand %p207_p5, %p201_p2 }
  0x2f   :  { %142 = vmatmul.mubr.msk.bf16.vlgmr.msra.gmra.mrb[0].mxu0 %vm67_vm1, %v43_v4 }
 0x102   :  { %v105_v6 = vpop.f32.mrb[0].mxu0 }
 0x103   :  { %v106_v7 = vadd.f32 %v130_v5, %v105_v6  ;;  %v143_v8 = vpop.f32.mrb[1].mxu0 }
 0x104   :  { %v108_v9 = vpop.f32.mrb[2].mxu0 }
 0x105   :  { %154 = vtanh.f32 %v106_v7  ;;  %v144_v10 = vpop.f32.mrb[3].mxu0 }
 0x10f   :  { %v155_v11 = vpop.eup %154 }
 0x110   :  { %113 = vst.msk [vmem:[#allocation7] sm:$0xff] %vm112_vm2, %v155_v11 }
 0x111   :  { %211 = shalt.err (!%p208_p6)
}
 0x112   :  { %s212_s15 = scalar_lea.hbm %s304_s3, 128 }
 0x113   :  { %p213_p7 = scmp.ne.s32.totalorder %s304_s3, %s212_s15  ;;  %p216_p8 = scmp.lt.u32.totalorder %s212_s15, %s304_s3 }
 0x115   :  { %p218_p9 = pnand %p216_p8, %p213_p7 }
 0x117   :  { %221 = shalt.err (!%p218_p9)
}
 0x118   :  { %123 = dma.vmem_to_hbm [thread:$0]  %s121_s12, 128, %s304_s3, [#allocation4]  }
 0x119   :  { %226 = dma.done.wait [#allocation4], 128  }
 0x11a   :  { %227 = vsyncadd [#allocation4], 4294967168 }
 0x11b   :  { %127 = vsyncpa [#allocation3], 1 }
 0x11c   :  { %128 = vsyncpa [#allocation6], 1 }
 0x11d   :  { %129 = vsyncpa [#allocation4], 1 }

</bundles_post_ra>
